<compile_context>
chip_gen: v5e
topology: v5e:2x2
jax: 0.10.0
libtpu: 0.0.40
codegen_flags: <defaults>
</compile_context>

<pallas_src>
import functools
import math

import jax
import jax.numpy as jnp
from jax import lax
from jax.experimental import pallas as pl
from jax.experimental.pallas import tpu as pltpu


def _ihs_kernel(x_ref, w_ref, mask_ref, out_ref, im2col_ref, *,
                width, hw, n_img, in_channels, rows_img, rows_conv, ones_rows):
    """One grid step: conv for `n_img` images + fused raw-view / ones epilogue.

    x_ref     : (C, n_img*HW)    channel rows; lane n = (local image)*HW + spatial
    w_ref     : (O, 9*C)         w_ref[o, (kh*3+kw)*C + c] = weight[o, c, kh, kw]
    mask_ref  : (9*C, n_img*HW)  0/1 'same'-padding validity per tap (precomputed)
    out_ref   : (Bt, rows_total, 128)  fused hidden states, torch raw-view order
    im2col_ref: (9*C, n_img*HW)  VMEM scratch holding the masked im2col matrix
    """
    x = x_ref[...]                      # (C, N)
    n_lanes = x.shape[-1]

    # Build the 9 masked taps with XLU lane rotations.  roll wraps around the
    # whole lane span; the precomputed row/col mask supplies the 'same' zero
    # padding and also kills any cross-image / cross-row contamination.
    k = 0
    for dh in (-1, 0, 1):
        for dw in (-1, 0, 1):
            shift = dh * width + dw     # tap[p] = x[p + shift] (when valid)
            rows = slice(k * in_channels, (k + 1) * in_channels)
            if shift == 0:
                im2col_ref[rows, :] = x
            else:
                t = pltpu.roll(x, (-shift) % n_lanes, axis=1)
                im2col_ref[rows, :] = t * mask_ref[rows, :]
            k += 1

    # Single wide MXU dot: (O, 9C) @ (9C, n_img*HW).
    y = jnp.dot(w_ref[...], im2col_ref[...],
                preferred_element_type=jnp.float32)            # (O, N)

    # Fused epilogue: per image, write its (O, HW) conv output in raw
    # (torch .view) order as lane-dense rows of 128, then the ones tail.
    for j in range(n_img):
        sample = j // in_channels
        base = (j % in_channels) * rows_img
        yj = y[:, j * hw:(j + 1) * hw]                         # (O, HW)
        # (O, HW) -> (O*HW/128, 128): small in-VMEM relayout, raw order kept.
        out_ref[sample, base:base + rows_img, :] = yj.reshape(rows_img, 128)
    if ones_rows:
        out_ref[:, rows_conv:, :] = jnp.ones(
            (out_ref.shape[0], ones_rows, 128), jnp.float32)


def _tap_mask(channels, height, width, n_img):
    """(9C, n_img*H*W) 0/1 mask: validity of each 3x3 tap under 'same' padding."""
    n = n_img * height * width
    pos = jnp.arange(n, dtype=jnp.int32)
    col = pos % width
    row = (pos // width) % height
    rows = []
    for dh in (-1, 0, 1):
        ok_r = jnp.ones((n,), jnp.bool_)
        if dh == -1:
            ok_r = row >= 1
        elif dh == 1:
            ok_r = row <= height - 2
        for dw in (-1, 0, 1):
            ok = ok_r
            if dw == -1:
                ok = ok & (col >= 1)
            elif dw == 1:
                ok = ok & (col <= width - 2)
            rows.append(jnp.broadcast_to(ok, (channels, n)))
    return jnp.concatenate(rows, axis=0).astype(jnp.float32)


def _pick_block_samples(num_samples, cap=64):
    """Largest divisor of num_samples <= cap that still leaves >= 2 grid steps."""
    if num_samples == 1:
        return 1
    best = 1
    for bt in range(1, min(num_samples, cap) + 1):
        if num_samples % bt == 0 and num_samples // bt >= 2:
            best = bt
    return best


def input_hidden_states(x_nchw, weight_oihw, num_neurons, *, block_samples=None):
    """Fused forward of InputHiddenStateInitializer.

    3x3 / stride-1 / 'same' / bias-free conv, followed (inside the same kernel)
    by the torch `.view(-1, C*H*W, hidden)` raw reinterpretation and the
    ones-initialized tail for the remaining `num_neurons - C*H*W` neurons.
    Returns (B // C, num_neurons, hidden) float32.
    """
    B, C, H, W = x_nchw.shape
    O = weight_oihw.shape[0]
    HW = H * W
    if B % C != 0:
        raise ValueError("batch must be divisible by channels (torch .view requirement)")
    if num_neurons < C * HW:
        raise ValueError("num_neurons must be >= C*H*W")
    if (O * HW) % 128 or (O * num_neurons) % 128:
        # TODO(synk): unfused fallback for raw views that do not decompose into
        # whole 128-lane rows.
        raise NotImplementedError("hidden*H*W and hidden*num_neurons must be multiples of 128")

    num_samples = B // C
    rows_img = (O * HW) // 128          # 128-lane rows per image's conv output
    rows_conv = C * rows_img            # conv rows per output sample
    rows_total = (O * num_neurons) // 128
    ones_rows = rows_total - rows_conv

    bt = block_samples or _pick_block_samples(num_samples)
    if num_samples % bt:
        raise ValueError("block_samples must divide the number of output samples")
    n_img = bt * C                      # images handled per grid step
    n_lanes = n_img * HW
    grid = (num_samples // bt,)

    # Layout plumbing (free reshape for C == 1): lane n of channel row c holds
    # image n // HW, spatial position n % HW.
    x_slab = (x_nchw.reshape(B, C, HW).transpose(1, 0, 2)
              .reshape(C, B * HW).astype(jnp.float32))
    w_mat = jnp.transpose(weight_oihw, (0, 2, 3, 1)).reshape(O, 9 * C)
    w_mat = w_mat.astype(jnp.float32)
    mask = _tap_mask(C, H, W, n_img)    # constant across grid steps

    kernel = functools.partial(
        _ihs_kernel, width=W, hw=HW, n_img=n_img, in_channels=C,
        rows_img=rows_img, rows_conv=rows_conv, ones_rows=ones_rows)

    out = pl.pallas_call(
        kernel,
        out_shape=jax.ShapeDtypeStruct((num_samples, rows_total, 128), jnp.float32),
        grid=grid,
        in_specs=[
            pl.BlockSpec((C, n_lanes), lambda g: (0, g)),
            pl.BlockSpec((O, 9 * C), lambda g: (0, 0)),
            pl.BlockSpec((9 * C, n_lanes), lambda g: (0, 0)),
        ],
        out_specs=pl.BlockSpec((bt, rows_total, 128), lambda g: (g, 0, 0)),
        scratch_shapes=[pltpu.VMEM((9 * C, n_lanes), jnp.float32)],
        compiler_params=pltpu.CompilerParams(dimension_semantics=("parallel",)),
    )(x_slab, w_mat, mask)

    # Free reinterpretation of the lane-dense (rows_total, 128) slab.
    return out.reshape(num_samples, num_neurons, O)


class InputHiddenStateInitializer:
    """JAX/Pallas port of the PyTorch module (kernel_size fixed at 3)."""

    def __init__(self, hidden_state_size, num_neurons, image_shape, key, kernel_size=3):
        if kernel_size != 3:
            raise NotImplementedError("this port implements the default kernel_size=3")
        self.hidden_state_size = hidden_state_size
        self.num_neurons = num_neurons
        self.image_shape = image_shape
        C = image_shape[0]
        # Deterministic init mimicking torch's default Conv2d (uniform, fan_in).
        bound = 1.0 / math.sqrt(C * kernel_size * kernel_size)
        self.weight = jax.random.uniform(
            key, (hidden_state_size, C, kernel_size, kernel_size),
            minval=-bound, maxval=bound, dtype=jnp.float32)

    def __call__(self, x):
        C, H, W = self.image_shape
        x = x.reshape(-1, C, H, W)
        return input_hidden_states(x, self.weight, self.num_neurons)


if __name__ == "__main__":
    key = jax.random.PRNGKey(0)
    k_w, k_x = jax.random.split(key)

    hidden_state_size = 32
    image_shape = (1, 16, 16)          # (C, H, W) -- grayscale, intended usage
    num_neurons = 300                  # > C*H*W = 256
    batch = 8                          # exercises image batching (4 per step, 2 steps)

    mod = InputHiddenStateInitializer(hidden_state_size, num_neurons,
                                      image_shape, k_w)
    x = jax.random.normal(k_x, (batch, *image_shape), dtype=jnp.float32)

    out = jax.block_until_ready(mod(x))

    # Reference: XLA conv + identical torch-style glue.
    ref_conv = lax.conv_general_dilated(
        x, mod.weight, window_strides=(1, 1), padding="SAME",
        dimension_numbers=("NCHW", "OIHW", "NCHW"),
        precision=lax.Precision.HIGHEST)
    C, H, W = image_shape
    ref_ihs = ref_conv.reshape(-1, C * H * W, hidden_state_size)
    ref = jnp.concatenate(
        [ref_ihs,
         jnp.ones((ref_ihs.shape[0], num_neurons - C * H * W,
                   hidden_state_size), jnp.float32)], axis=1)

    assert out.shape == (batch // C, num_neurons, hidden_state_size), out.shape
    assert out.dtype == jnp.float32
    assert jnp.allclose(out, ref, atol=2e-4, rtol=2e-4), \
        float(jnp.max(jnp.abs(out - ref)))
    print("KERNEL_OK")
</pallas_src>

<mosaic_0001>
module attributes {stable_mosaic.version = 11 : i64} {
  func.func @_ihs_kernel(%arg0: i32, %arg1: memref<1x1024xf32, #tpu.memory_space<vmem>>, %arg2: memref<32x9xf32, #tpu.memory_space<vmem>>, %arg3: memref<9x1024xf32, #tpu.memory_space<vmem>>, %arg4: memref<4x75x128xf32, #tpu.memory_space<vmem>>, %arg5: memref<9x1024xf32, #tpu.memory_space<vmem>>) attributes {dimension_semantics = [#tpu.dimension_semantics<parallel>], iteration_bounds = array<i64: 2>, scalar_prefetch = 0 : i64, scratch_operands = 1 : i64, tpu.core_type = #tpu.core_type<tc>, window_params = [{transform_indices = @transform_0, window_bounds = array<i64: 1, 1024>}, {pipeline_mode = #tpu.pipeline_mode<synchronous>, transform_indices = @transform_1, window_bounds = array<i64: 32, 9>}, {pipeline_mode = #tpu.pipeline_mode<synchronous>, transform_indices = @transform_2, window_bounds = array<i64: 9, 1024>}, {transform_indices = @transform_3, window_bounds = array<i64: 4, 75, 128>}]} {
    %c0 = arith.constant 0 : index
    %c0_0 = arith.constant 0 : index
    %0 = vector.load %arg1[%c0, %c0_0] : memref<1x1024xf32, #tpu.memory_space<vmem>>, vector<1x1024xf32>
    %c17_i32 = arith.constant 17 : i32
    %1 = tpu.dynamic_rotate %0 by %c17_i32 dim 1 : vector<1x1024xf32>, i32 -> vector<1x1024xf32>
    %c0_1 = arith.constant 0 : index
    %c0_2 = arith.constant 0 : index
    %2 = vector.load %arg3[%c0_1, %c0_2] : memref<9x1024xf32, #tpu.memory_space<vmem>>, vector<1x1024xf32>
    %3 = arith.mulf %1, %2 : vector<1x1024xf32>
    %c0_3 = arith.constant 0 : index
    %c0_4 = arith.constant 0 : index
    %4 = vector.load %arg5[%c0_3, %c0_4] : memref<9x1024xf32, #tpu.memory_space<vmem>>, vector<1x1024xf32>
    tpu.vector_store %arg5[%c0_3, %c0_4], %3 {strides = array<i32>} : memref<9x1024xf32, #tpu.memory_space<vmem>>, vector<1x1024xf32>,
    %c16_i32 = arith.constant 16 : i32
    %5 = tpu.dynamic_rotate %0 by %c16_i32 dim 1 : vector<1x1024xf32>, i32 -> vector<1x1024xf32>
    %c1 = arith.constant 1 : index
    %c0_5 = arith.constant 0 : index
    %6 = vector.load %arg3[%c1, %c0_5] : memref<9x1024xf32, #tpu.memory_space<vmem>>, vector<1x1024xf32>
    %7 = arith.mulf %5, %6 : vector<1x1024xf32>
    %c1_6 = arith.constant 1 : index
    %c0_7 = arith.constant 0 : index
    %8 = vector.load %arg5[%c1_6, %c0_7] : memref<9x1024xf32, #tpu.memory_space<vmem>>, vector<1x1024xf32>
    tpu.vector_store %arg5[%c1_6, %c0_7], %7 {strides = array<i32>} : memref<9x1024xf32, #tpu.memory_space<vmem>>, vector<1x1024xf32>,
    %c15_i32 = arith.constant 15 : i32
    %9 = tpu.dynamic_rotate %0 by %c15_i32 dim 1 : vector<1x1024xf32>, i32 -> vector<1x1024xf32>
    %c2 = arith.constant 2 : index
    %c0_8 = arith.constant 0 : index
    %10 = vector.load %arg3[%c2, %c0_8] : memref<9x1024xf32, #tpu.memory_space<vmem>>, vector<1x1024xf32>
    %11 = arith.mulf %9, %10 : vector<1x1024xf32>
    %c2_9 = arith.constant 2 : index
    %c0_10 = arith.constant 0 : index
    %12 = vector.load %arg5[%c2_9, %c0_10] : memref<9x1024xf32, #tpu.memory_space<vmem>>, vector<1x1024xf32>
    tpu.vector_store %arg5[%c2_9, %c0_10], %11 {strides = array<i32>} : memref<9x1024xf32, #tpu.memory_space<vmem>>, vector<1x1024xf32>,
    %c1_i32 = arith.constant 1 : i32
    %13 = tpu.dynamic_rotate %0 by %c1_i32 dim 1 : vector<1x1024xf32>, i32 -> vector<1x1024xf32>
    %c3 = arith.constant 3 : index
    %c0_11 = arith.constant 0 : index
    %14 = vector.load %arg3[%c3, %c0_11] : memref<9x1024xf32, #tpu.memory_space<vmem>>, vector<1x1024xf32>
    %15 = arith.mulf %13, %14 : vector<1x1024xf32>
    %c3_12 = arith.constant 3 : index
    %c0_13 = arith.constant 0 : index
    %16 = vector.load %arg5[%c3_12, %c0_13] : memref<9x1024xf32, #tpu.memory_space<vmem>>, vector<1x1024xf32>
    tpu.vector_store %arg5[%c3_12, %c0_13], %15 {strides = array<i32>} : memref<9x1024xf32, #tpu.memory_space<vmem>>, vector<1x1024xf32>,
    %c4 = arith.constant 4 : index
    %c0_14 = arith.constant 0 : index
    %17 = vector.load %arg5[%c4, %c0_14] : memref<9x1024xf32, #tpu.memory_space<vmem>>, vector<1x1024xf32>
    tpu.vector_store %arg5[%c4, %c0_14], %0 {strides = array<i32>} : memref<9x1024xf32, #tpu.memory_space<vmem>>, vector<1x1024xf32>,
    %c1023_i32 = arith.constant 1023 : i32
    %18 = tpu.dynamic_rotate %0 by %c1023_i32 dim 1 : vector<1x1024xf32>, i32 -> vector<1x1024xf32>
    %c5 = arith.constant 5 : index
    %c0_15 = arith.constant 0 : index
    %19 = vector.load %arg3[%c5, %c0_15] : memref<9x1024xf32, #tpu.memory_space<vmem>>, vector<1x1024xf32>
    %20 = arith.mulf %18, %19 : vector<1x1024xf32>
    %c5_16 = arith.constant 5 : index
    %c0_17 = arith.constant 0 : index
    %21 = vector.load %arg5[%c5_16, %c0_17] : memref<9x1024xf32, #tpu.memory_space<vmem>>, vector<1x1024xf32>
    tpu.vector_store %arg5[%c5_16, %c0_17], %20 {strides = array<i32>} : memref<9x1024xf32, #tpu.memory_space<vmem>>, vector<1x1024xf32>,
    %c1009_i32 = arith.constant 1009 : i32
    %22 = tpu.dynamic_rotate %0 by %c1009_i32 dim 1 : vector<1x1024xf32>, i32 -> vector<1x1024xf32>
    %c6 = arith.constant 6 : index
    %c0_18 = arith.constant 0 : index
    %23 = vector.load %arg3[%c6, %c0_18] : memref<9x1024xf32, #tpu.memory_space<vmem>>, vector<1x1024xf32>
    %24 = arith.mulf %22, %23 : vector<1x1024xf32>
    %c6_19 = arith.constant 6 : index
    %c0_20 = arith.constant 0 : index
    %25 = vector.load %arg5[%c6_19, %c0_20] : memref<9x1024xf32, #tpu.memory_space<vmem>>, vector<1x1024xf32>
    tpu.vector_store %arg5[%c6_19, %c0_20], %24 {strides = array<i32>} : memref<9x1024xf32, #tpu.memory_space<vmem>>, vector<1x1024xf32>,
    %c1008_i32 = arith.constant 1008 : i32
    %26 = tpu.dynamic_rotate %0 by %c1008_i32 dim 1 : vector<1x1024xf32>, i32 -> vector<1x1024xf32>
    %c7 = arith.constant 7 : index
    %c0_21 = arith.constant 0 : index
    %27 = vector.load %arg3[%c7, %c0_21] : memref<9x1024xf32, #tpu.memory_space<vmem>>, vector<1x1024xf32>
    %28 = arith.mulf %26, %27 : vector<1x1024xf32>
    %c7_22 = arith.constant 7 : index
    %c0_23 = arith.constant 0 : index
    %29 = vector.load %arg5[%c7_22, %c0_23] : memref<9x1024xf32, #tpu.memory_space<vmem>>, vector<1x1024xf32>
    tpu.vector_store %arg5[%c7_22, %c0_23], %28 {strides = array<i32>} : memref<9x1024xf32, #tpu.memory_space<vmem>>, vector<1x1024xf32>,
    %c1007_i32 = arith.constant 1007 : i32
    %30 = tpu.dynamic_rotate %0 by %c1007_i32 dim 1 : vector<1x1024xf32>, i32 -> vector<1x1024xf32>
    %c8 = arith.constant 8 : index
    %c0_24 = arith.constant 0 : index
    %31 = vector.load %arg3[%c8, %c0_24] : memref<9x1024xf32, #tpu.memory_space<vmem>>, vector<1x1024xf32>
    %32 = arith.mulf %30, %31 : vector<1x1024xf32>
    %c8_25 = arith.constant 8 : index
    %c0_26 = arith.constant 0 : index
    %33 = vector.load %arg5[%c8_25, %c0_26] : memref<9x1024xf32, #tpu.memory_space<vmem>>, vector<1x1024xf32>
    tpu.vector_store %arg5[%c8_25, %c0_26], %32 {strides = array<i32>} : memref<9x1024xf32, #tpu.memory_space<vmem>>, vector<1x1024xf32>,
    %c0_27 = arith.constant 0 : index
    %c0_28 = arith.constant 0 : index
    %34 = vector.load %arg2[%c0_27, %c0_28] : memref<32x9xf32, #tpu.memory_space<vmem>>, vector<32x9xf32>
    %c0_29 = arith.constant 0 : index
    %c0_30 = arith.constant 0 : index
    %35 = vector.load %arg5[%c0_29, %c0_30] : memref<9x1024xf32, #tpu.memory_space<vmem>>, vector<9x1024xf32>
    %cst = arith.constant dense<0.000000e+00> : vector<32x1024xf32>
    %36 = tpu.matmul %34, %35, %cst {dimension_numbers = #tpu.dot_dimension_numbers<[1], [0], [0], [1], [0, 0, 1, 1], [], []>} : vector<32x9xf32>, vector<9x1024xf32>, vector<32x1024xf32> -> vector<32x1024xf32>
    %37 = vector.extract_strided_slice %36 {offsets = [0, 0], sizes = [32, 256], strides = [1, 1]} : vector<32x1024xf32> to vector<32x256xf32>
    %38 = vector.shape_cast %37 : vector<32x256xf32> to vector<64x128xf32>
    %c0_31 = arith.constant 0 : index
    %c0_32 = arith.constant 0 : index
    %c0_33 = arith.constant 0 : index
    %39 = vector.load %arg4[%c0_31, %c0_32, %c0_33] : memref<4x75x128xf32, #tpu.memory_space<vmem>>, vector<1x64x128xf32>
    %40 = vector.shape_cast %39 : vector<1x64x128xf32> to vector<64x128xf32>
    %41 = vector.shape_cast %38 : vector<64x128xf32> to vector<1x64x128xf32>
    tpu.vector_store %arg4[%c0_31, %c0_32, %c0_33], %41 {strides = array<i32>} : memref<4x75x128xf32, #tpu.memory_space<vmem>>, vector<1x64x128xf32>,
    %42 = vector.extract_strided_slice %36 {offsets = [0, 256], sizes = [32, 256], strides = [1, 1]} : vector<32x1024xf32> to vector<32x256xf32>
    %43 = vector.shape_cast %42 : vector<32x256xf32> to vector<64x128xf32>
    %c1_34 = arith.constant 1 : index
    %c0_35 = arith.constant 0 : index
    %c0_36 = arith.constant 0 : index
    %44 = vector.load %arg4[%c1_34, %c0_35, %c0_36] : memref<4x75x128xf32, #tpu.memory_space<vmem>>, vector<1x64x128xf32>
    %45 = vector.shape_cast %44 : vector<1x64x128xf32> to vector<64x128xf32>
    %46 = vector.shape_cast %43 : vector<64x128xf32> to vector<1x64x128xf32>
    tpu.vector_store %arg4[%c1_34, %c0_35, %c0_36], %46 {strides = array<i32>} : memref<4x75x128xf32, #tpu.memory_space<vmem>>, vector<1x64x128xf32>,
    %47 = vector.extract_strided_slice %36 {offsets = [0, 512], sizes = [32, 256], strides = [1, 1]} : vector<32x1024xf32> to vector<32x256xf32>
    %48 = vector.shape_cast %47 : vector<32x256xf32> to vector<64x128xf32>
    %c2_37 = arith.constant 2 : index
    %c0_38 = arith.constant 0 : index
    %c0_39 = arith.constant 0 : index
    %49 = vector.load %arg4[%c2_37, %c0_38, %c0_39] : memref<4x75x128xf32, #tpu.memory_space<vmem>>, vector<1x64x128xf32>
    %50 = vector.shape_cast %49 : vector<1x64x128xf32> to vector<64x128xf32>
    %51 = vector.shape_cast %48 : vector<64x128xf32> to vector<1x64x128xf32>
    tpu.vector_store %arg4[%c2_37, %c0_38, %c0_39], %51 {strides = array<i32>} : memref<4x75x128xf32, #tpu.memory_space<vmem>>, vector<1x64x128xf32>,
    %52 = vector.extract_strided_slice %36 {offsets = [0, 768], sizes = [32, 256], strides = [1, 1]} : vector<32x1024xf32> to vector<32x256xf32>
    %53 = vector.shape_cast %52 : vector<32x256xf32> to vector<64x128xf32>
    %c3_40 = arith.constant 3 : index
    %c0_41 = arith.constant 0 : index
    %c0_42 = arith.constant 0 : index
    %54 = vector.load %arg4[%c3_40, %c0_41, %c0_42] : memref<4x75x128xf32, #tpu.memory_space<vmem>>, vector<1x64x128xf32>
    %55 = vector.shape_cast %54 : vector<1x64x128xf32> to vector<64x128xf32>
    %56 = vector.shape_cast %53 : vector<64x128xf32> to vector<1x64x128xf32>
    tpu.vector_store %arg4[%c3_40, %c0_41, %c0_42], %56 {strides = array<i32>} : memref<4x75x128xf32, #tpu.memory_space<vmem>>, vector<1x64x128xf32>,
    %cst_43 = arith.constant 1.000000e+00 : f32
    %57 = vector.broadcast %cst_43 : f32 to vector<4x11x128xf32>
    %c0_44 = arith.constant 0 : index
    %c64 = arith.constant 64 : index
    %c0_45 = arith.constant 0 : index
    %58 = vector.load %arg4[%c0_44, %c64, %c0_45] : memref<4x75x128xf32, #tpu.memory_space<vmem>>, vector<4x11x128xf32>
    tpu.vector_store %arg4[%c0_44, %c64, %c0_45], %57 {strides = array<i32>} : memref<4x75x128xf32, #tpu.memory_space<vmem>>, vector<4x11x128xf32>,
    return
  }
  func.func @transform_0(%arg0: i32) -> (i32, i32) {
    %c0_i32 = arith.constant 0 : i32
    %c0_i32_0 = arith.constant 0 : i32
    return %c0_i32, %arg0 : i32, i32
  }
  func.func @transform_1(%arg0: i32) -> (i32, i32) {
    %c0_i32 = arith.constant 0 : i32
    %c0_i32_0 = arith.constant 0 : i32
    %c0_i32_1 = arith.constant 0 : i32
    return %c0_i32, %c0_i32_0 : i32, i32
  }
  func.func @transform_2(%arg0: i32) -> (i32, i32) {
    %c0_i32 = arith.constant 0 : i32
    %c0_i32_0 = arith.constant 0 : i32
    %c0_i32_1 = arith.constant 0 : i32
    return %c0_i32, %c0_i32_0 : i32, i32
  }
  func.func @transform_3(%arg0: i32) -> (i32, i32, i32) {
    %c0_i32 = arith.constant 0 : i32
    %c0_i32_0 = arith.constant 0 : i32
    %c0_i32_1 = arith.constant 0 : i32
    return %arg0, %c0_i32, %c0_i32_0 : i32, i32, i32
  }
}

</mosaic_0001>

<bundles_post_ra>
// kernel: tpu_custom_call.1
= control target key start
LH: loop header
LB: loop body
LE: loop exit
PB: predicated region body
PF: predicated region fallthrough
CT: control target
= control target key end

     0   :  { %8 = vsyncpa [#allocation4], 0  ;;  %s1726_s12 = smov 0   ;;  %s2210_s0 = inlined_call_operand.vmem [shape: f32[1,2048], index: 0, kind: input, shape index: {}]   ;;  %s2211_s1 = inlined_call_operand.vmem [shape: f32[32,9], index: 1, kind: input, shape index: {}]   ;;  %s2212_s2 = inlined_call_operand.hbm [shape: f32[9,1024], index: 2, kind: input, shape index: {}]   ;;  %s2213_s3 = inlined_call_operand.vmem [shape: f32[8,75,128], index: 3, kind: output, shape index: {}]  }
   0x1 LB: > { %s127_s15 = sshll.u32 %s2212_s2, 4  ;;  %s1513_s16 = sadd.s32 4294967295, %s1692_s12   ;;  %s1692_s12 = sphi %s1726_s12, %s14_s12   ;;  %s128_s15 = int_to_ptr.hbm [resolvable:$true] %s127_s15 }
   0x2   : > { %p1515_p0 = scmp.ge.s32.totalorder %s1692_s12, 1  ;;  %p113_p1 = scmp.lt.s32.totalorder %s1692_s12, 3 }
   0x3   : > { %p1630_p2 = scmp.eq.s32.totalorder %s1513_s16, 0  ;;  %s1694_s17 = smov [#allocation3]  }
   0x4   : > { %p114_p3 = pnand %p1515_p0, %p113_p1  ;;  %s129_s18 = sshll.u32 %s1694_s17, 4  ;;  %s130_s18 = int_to_ptr.vmem [resolvable:$true] %s129_s18 }
   0x5   : > { %s1695_s19 = smov 1024   ;;  %s1696_s20 = smov 64  }
   0x6   : > { %p1626_p4 = pneg %p114_p3  ;;  %153 = sbr.rel (%p114_p3) target bundleno = 515 (0x203), region = 32 }
   0x8   : > { %p1627_p5 = pnand %p1630_p2, %p1626_p4 }
   0xa   : > { %1629 = dma.hbm_to_vmem [thread:$0]  (!%p1627_p5), %s128_s15, 2048, %s130_s18, [#allocation4], %s1695_s19, %s1695_s19, %s1696_s20  }
   0xb   : > { %1687 = dma.done.wait (%p1630_p2), [#allocation4], 2048  }
   0xc   : > { %1689 = vsyncadd (%p1630_p2), [#allocation4], 4294965248  ;;  %s1521_s21 = sshll.u32 %s1513_s16, 2  ;;  %s1520_s22 = sshll.u32 %s1513_s16, 3  ;;  %v1697_v1 = vmov 1.0   ;;  %v224_v13 = vlaneseq  ;;  %vm280_vm1 = vcmask 1042434  }
   0xd   : > { %p184_p6 = scmp.lt.s32.totalorder %s1521_s21, 7  ;;  %p179_p7 = scmp.lt.s32.totalorder %s1520_s22, 15  ;;  %v804_v14 = vld [vmem:[#allocation3 + $0x40] ss:$8 sm:$0xf]  ;;  %vm278_vm2 = vcmask 1040384  }
   0xe   : > { %s1698_s30 = smov 111   ;;  %s1699_s4 = smov 17   ;;  %v805_v15 = vld [vmem:[#allocation3 + $0x40] ss:$8 sm:$0xf0]  ;;  %v1818_v19 = vand.u32 127, %v224_v13 }
   0xf   : > { %s2215_s21 = smov (!%p184_p6, %s1521_s21), 7  ;;  %s2217_s22 = smov (!%p179_p7, %s1520_s22), 15  ;;  %v806_v20 = vor.u32 %v805_v15, %v804_v14  ;;  %vm282_vm3 = vcmask 1041408   ;;  %vm284_vm4 = vcmask 1044484   ;;  %vm286_vm5 = vcmask 1046534  }
  0x10   : > { %s1621_s23 = smul.u32 80, %s2215_s21  ;;  %s181_s26 = scalar_lea.vmem %s2210_s0, %s2217_s22  ;;  %vm794_vm0 = vcmp.lt.s32.totalorder %v1818_v19, 111  ;;  %vm288_vm6 = vcmask 1045508   ;;  %vm290_vm7 = vcmask 1043456   ;;  %vm226_vm8 = vcmp.lt.s32.totalorder %v1818_v19, 17 }
  0x11   : > { %v190_v0 = vld [vmem:[%s181_s26] sm:$0xff]  ;;  %s1700_s5 = smov 16   ;;  %s1701_s6 = smov 15   ;;  %v810_v21 = vperm.slane %v806_v20, 2  ;;  %v811_v22 = vperm.slane %v806_v20, 3  ;;  %v809_v24 = vperm.slane %v806_v20, 1 }
  0x12   : > { %s1743_s29 = scalar_lea.vmem %s2213_s3, %s1621_s23  ;;  %v1746_v2 = vperm.slane %v190_v0, 2  ;;  %v1748_v3 = vperm.slane %v190_v0, 0  ;;  %v1751_v4 = vperm.slane %v190_v0, 4  ;;  %v1761_v5 = vperm.slane %v190_v0, 3  ;;  %s1702_s7 = smov 1  }
  0x13   : > { %1438 = vst [vmem:[%s1743_s29 + $0x40] sm:$0xff] %v1697_v1  ;;  %v1763_v6 = vperm.slane %v190_v0, 1  ;;  %v1766_v7 = vperm.slane %v190_v0, 5  ;;  %v1771_v8 = vperm.slane %v190_v0, 7  ;;  %v1773_v9 = vperm.slane %v190_v0, 6  ;;  %s1703_s8 = smov 127  }
  0x14   : > { %1439 = vst [vmem:[%s1743_s29 + $0x48] sm:$0x7] %v1697_v1  ;;  %782 = vrot.lane.b32.xlu1 %v1746_v2, %s1698_s30  ;;  %778 = vrot.lane.b32.xlu0 %v1748_v3, %s1698_s30  ;;  %v812_v30 = vperm.slane %v806_v20, 4  ;;  %v808_v35 = vperm.slane %v806_v20, 0  ;;  %s1704_s9 = smov 113   ;;  %v815_v36 = vperm.slane %v806_v20, 7 }
  0x15   : > { %1440 = vst [vmem:[%s1743_s29 + $0x90] sm:$0xff] %v1697_v1  ;;  %786 = vrot.lane.b32.xlu2 %v1751_v4, %s1698_s30  ;;  %v813_v37 = vperm.slane %v806_v20, 5  ;;  %v814_v38 = vperm.slane %v806_v20, 6  ;;  %s1705_s10 = smov 112   ;;  %vm311_vm9 = vcmp.lt.s32.totalorder %v1818_v19, 16  ;;  %vm391_vm10 = vcmp.lt.s32.totalorder %v1818_v19, 15 }
  0x16   : > { %1441 = vst [vmem:[%s1743_s29 + $0x98] sm:$0x7] %v1697_v1  ;;  %vm471_vm11 = vcmp.lt.s32.totalorder %v1818_v19, 1  ;;  %vm554_vm12 = vcmp.lt.s32.totalorder %v1818_v19, 127  ;;  %vm634_vm13 = vcmp.lt.s32.totalorder %v1818_v19, 113  ;;  %vm714_vm14 = vcmp.lt.s32.totalorder %v1818_v19, 112 }
  0x17   : > { %1442 = vst [vmem:[%s1743_s29 + $0xe0] sm:$0xff] %v1697_v1  ;;  %vm878_vm15 = vcmask 72704  }
  0x18   : > { %1443 = vst [vmem:[%s1743_s29 + $0xe8] sm:$0x7] %v1697_v1 }
  0x19   : > { %1444 = vst [vmem:[%s1743_s29 + $0x130] sm:$0xff] %v1697_v1 }
  0x1a   : > { %1445 = vst [vmem:[%s1743_s29 + $0x138] sm:$0x7] %v1697_v1  ;;  %v235_v1 = vld [vmem:[#allocation3] ss:$8 sm:$0xf] }
  0x1b   : > { %536 = vst [vmem:[#allocation2 + $0x4] ss:$8 sm:$0xf] %v190_v0 }
  0x1c   : > { %537 = vst [vmem:[#allocation2 + $0x4] ss:$8 sm:$0xf0] %v190_v0  ;;  %784 = vrot.lane.b32.xlu1 %v1761_v5, %s1698_s30  ;;  %780 = vrot.lane.b32.xlu0 %v1763_v6, %s1698_s30 }
  0x1d   : > { %788 = vrot.lane.b32.xlu2 %v1766_v7, %s1698_s30 }
  0x24   : > { %792 = vrot.lane.b32.xlu1 %v1771_v8, %s1698_s30  ;;  %790 = vrot.lane.b32.xlu0 %v1773_v9, %s1698_s30 }
  0x25   : > { %208 = vrot.lane.b32.xlu2 %v1748_v3, %s1699_s4 }
  0x2c   : > { %212 = vrot.lane.b32.xlu1 %v1746_v2, %s1699_s4  ;;  %210 = vrot.lane.b32.xlu0 %v1763_v6, %s1699_s4 }
  0x2d   : > { %214 = vrot.lane.b32.xlu2 %v1761_v5, %s1699_s4 }
  0x34   : > { %218 = vrot.lane.b32.xlu1 %v1766_v7, %s1699_s4  ;;  %216 = vrot.lane.b32.xlu0 %v1751_v4, %s1699_s4 }
  0x35   : > { %220 = vrot.lane.b32.xlu2 %v1773_v9, %s1699_s4 }
  0x3c   : > { %295 = vrot.lane.b32.xlu1 %v1748_v3, %s1700_s5  ;;  %222 = vrot.lane.b32.xlu0 %v1771_v8, %s1699_s4 }
  0x3d   : > { %297 = vrot.lane.b32.xlu2 %v1763_v6, %s1700_s5 }
  0x44   : > { %301 = vrot.lane.b32.xlu1 %v1761_v5, %s1700_s5  ;;  %299 = vrot.lane.b32.xlu0 %v1746_v2, %s1700_s5 }
  0x45   : > { %303 = vrot.lane.b32.xlu2 %v1751_v4, %s1700_s5 }
  0x4c   : > { %307 = vrot.lane.b32.xlu1 %v1773_v9, %s1700_s5  ;;  %305 = vrot.lane.b32.xlu0 %v1766_v7, %s1700_s5 }
  0x4d   : > { %309 = vrot.lane.b32.xlu2 %v1771_v8, %s1700_s5 }
  0x54   : > { %377 = vrot.lane.b32.xlu1 %v1763_v6, %s1701_s6  ;;  %375 = vrot.lane.b32.xlu0 %v1748_v3, %s1701_s6 }
  0x55   : > { %379 = vrot.lane.b32.xlu2 %v1746_v2, %s1701_s6 }
  0x5c   : > { %383 = vrot.lane.b32.xlu1 %v1751_v4, %s1701_s6  ;;  %381 = vrot.lane.b32.xlu0 %v1761_v5, %s1701_s6 }
  0x5d   : > { %385 = vrot.lane.b32.xlu2 %v1766_v7, %s1701_s6 }
  0x64   : > { %389 = vrot.lane.b32.xlu1 %v1771_v8, %s1701_s6  ;;  %387 = vrot.lane.b32.xlu0 %v1773_v9, %s1701_s6 }
  0x65   : > { %455 = vrot.lane.b32.xlu2 %v1748_v3, %s1702_s7 }
  0x6c   : > { %459 = vrot.lane.b32.xlu1 %v1746_v2, %s1702_s7  ;;  %457 = vrot.lane.b32.xlu0 %v1763_v6, %s1702_s7 }
  0x6d   : > { %461 = vrot.lane.b32.xlu2 %v1761_v5, %s1702_s7 }
  0x6f   : > { %v787_v10 = vpop.permute.xlu2 %786 }
  0x74   : > { %465 = vrot.lane.b32.xlu1 %v1766_v7, %s1702_s7  ;;  %463 = vrot.lane.b32.xlu0 %v1751_v4, %s1702_s7 }
  0x75   : > { %467 = vrot.lane.b32.xlu2 %v1773_v9, %s1702_s7 }
  0x77   : > { %v789_v11 = vpop.permute.xlu2 %788 }
  0x78   : > { %v797_v33 = vsel %vm794_vm0, %v787_v10, %v789_v11 }
  0x79   : > { %v828_v39 = vmul.f32 %v812_v30, %v797_v33 }
  0x7b   : > { %v843_v54 = vrot.slane %v828_v39, 4 }
  0x7c   : > { %538 = vrot.lane.b32.xlu1 %v1748_v3, %s1703_s8  ;;  %469 = vrot.lane.b32.xlu0 %v1771_v8, %s1702_s7 }
  0x7d   : > { %540 = vrot.lane.b32.xlu2 %v1763_v6, %s1703_s8 }
  0x7f   : > { %v1811_v12 = vpop.permute.xlu2 %208 }
  0x84   : > { %544 = vrot.lane.b32.xlu1 %v1761_v5, %s1703_s8  ;;  %542 = vrot.lane.b32.xlu0 %v1746_v2, %s1703_s8 }
  0x85   : > { %546 = vrot.lane.b32.xlu2 %v1751_v4, %s1703_s8 }
  0x86   : > { %v783_v16 = vpop.permute.xlu1 %782  ;;  %v779_v17 = vpop.permute.xlu0 %778 }
  0x87   : > { %v1816_v18 = vpop.permute.xlu2 %214 }
  0x8c   : > { %550 = vrot.lane.b32.xlu1 %v1773_v9, %s1703_s8  ;;  %548 = vrot.lane.b32.xlu0 %v1766_v7, %s1703_s8 }
  0x8d   : > { %552 = vrot.lane.b32.xlu2 %v1771_v8, %s1703_s8 }
  0x8e   : > { %v785_v23 = vpop.permute.xlu1 %784  ;;  %v781_v25 = vpop.permute.xlu0 %780 }
  0x8f   : > { %v798_v26 = vsel %vm794_vm0, %v785_v23, %v787_v10  ;;  %v799_v27 = vsel %vm794_vm0, %v783_v16, %v785_v23  ;;  %v800_v28 = vsel %vm794_vm0, %v781_v25, %v783_v16  ;;  %v1830_v29 = vpop.permute.xlu2 %220  ;;  %v801_v42 = vsel %vm794_vm0, %v779_v17, %v781_v25  ;;  %v236_v10 = vld [vmem:[#allocation3] ss:$8 sm:$0xf0] }
  0x90   : > { %v826_v31 = vmul.f32 %v810_v21, %v799_v27  ;;  %v827_v32 = vmul.f32 %v811_v22, %v798_v26  ;;  %v825_v34 = vmul.f32 %v809_v24, %v800_v28  ;;  %v824_v50 = vmul.f32 %v808_v35, %v801_v42 }
  0x91   : > { %v237_v15 = vor.u32 %v236_v10, %v235_v1 }
  0x92   : > { %v841_v40 = vrot.slane %v826_v31, 6  ;;  %v842_v41 = vrot.slane %v827_v32, 5  ;;  %v840_v43 = vrot.slane %v825_v34, 7 }
  0x93   : > { %v242_v16 = vperm.slane %v237_v15, 3  ;;  %v241_v26 = vperm.slane %v237_v15, 2  ;;  %v245_v28 = vperm.slane %v237_v15, 6  ;;  %v243_v33 = vperm.slane %v237_v15, 4 }
  0x94   : > { %620 = vrot.lane.b32.xlu1 %v1763_v6, %s1704_s9  ;;  %618 = vrot.lane.b32.xlu0 %v1748_v3, %s1704_s9  ;;  %v848_v55 = vsel %vm280_vm1, %v841_v40, %v842_v41  ;;  %v847_v56 = vsel %vm278_vm2, %v824_v50, %v840_v43  ;;  %v244_v34 = vperm.slane %v237_v15, 5  ;;  %v239_v43 = vperm.slane %v237_v15, 0 }
  0x95   : > { %622 = vrot.lane.b32.xlu2 %v1746_v2, %s1704_s9  ;;  %v849_v62 = vsel %vm282_vm3, %v847_v56, %v848_v55 }
  0x96   : > { %v793_v44 = vpop.permute.xlu1 %792  ;;  %v791_v45 = vpop.permute.xlu0 %790 }
  0x97   : > { %v802_v46 = vsel %vm794_vm0, %v793_v44, %v779_v17  ;;  %v795_v47 = vsel %vm794_vm0, %v791_v45, %v793_v44  ;;  %v796_v48 = vsel %vm794_vm0, %v789_v11, %v791_v45  ;;  %v1848_v49 = vpop.permute.xlu2 %297  ;;  %v240_v17 = vperm.slane %v237_v15, 1 }
  0x98   : > { %v831_v51 = vmul.f32 %v815_v36, %v802_v46  ;;  %v829_v52 = vmul.f32 %v813_v37, %v796_v48  ;;  %v830_v53 = vmul.f32 %v814_v38, %v795_v47  ;;  %v246_v44 = vperm.slane %v237_v15, 7 }
  0x9a   : > { %v846_v57 = vrot.slane %v831_v51, 1  ;;  %v844_v58 = vrot.slane %v829_v52, 3  ;;  %v845_v59 = vrot.slane %v830_v53, 2  ;;  %v321_v51 = vld [vmem:[#allocation3 + $0x1] ss:$8 sm:$0xf] }
  0x9c   : > { %v850_v60 = vsel %vm284_vm4, %v843_v54, %v844_v58  ;;  %v851_v61 = vsel %vm286_vm5, %v845_v59, %v846_v57  ;;  %626 = vrot.lane.b32.xlu1 %v1751_v4, %s1704_s9  ;;  %624 = vrot.lane.b32.xlu0 %v1761_v5, %s1704_s9 }
  0x9d   : > { %v852_v63 = vsel %vm288_vm6, %v850_v60, %v851_v61  ;;  %628 = vrot.lane.b32.xlu2 %v1766_v7, %s1704_s9 }
  0x9e   : > { %v853_v0 = vsel %vm290_vm7, %v849_v62, %v852_v63  ;;  %v213_v11 = vpop.permute.xlu1 %212  ;;  %v211_v13 = vpop.permute.xlu0 %210 }
  0x9f   : > { %856 = vst [vmem:[#allocation2 + $0x40] ss:$8 sm:$0xf] %v853_v0  ;;  %v1863_v14 = vpop.permute.xlu2 %303  ;;  %v231_v25 = vsel %vm226_vm8, %v213_v11, %v1816_v18  ;;  %v233_v27 = vsel %vm226_vm8, %v1811_v12, %v211_v13  ;;  %v232_v31 = vsel %vm226_vm8, %v211_v13, %v213_v11 }
  0xa0   : > { %857 = vst [vmem:[#allocation2 + $0x40] ss:$8 sm:$0xf0] %v853_v0  ;;  %v258_v37 = vmul.f32 %v242_v16, %v231_v25  ;;  %v256_v38 = vmul.f32 %v240_v17, %v233_v27  ;;  %v257_v39 = vmul.f32 %v241_v26, %v232_v31 }
  0xa2   : > { %v273_v45 = vrot.slane %v258_v37, 5  ;;  %v271_v46 = vrot.slane %v256_v38, 7  ;;  %v272_v48 = vrot.slane %v257_v39, 6 }
  0xa4   : > { %632 = vrot.lane.b32.xlu1 %v1771_v8, %s1704_s9  ;;  %630 = vrot.lane.b32.xlu0 %v1773_v9, %s1704_s9  ;;  %v281_v60 = vsel %vm280_vm1, %v272_v48, %v273_v45 }
  0xa5   : > { %698 = vrot.lane.b32.xlu2 %v1748_v3, %s1705_s10 }
  0xa6   : > { %v219_v20 = vpop.permute.xlu1 %218  ;;  %v217_v21 = vpop.permute.xlu0 %216  ;;  %v870_v22 = vld [vmem:[#allocation2 + $0x40] sm:$0x1]  ;;  %v871_v23 = vld [vmem:[#allocation2 + $0x48] sm:$0x1]  ;;  %v872_v24 = vld [vmem:[#allocation2 + $0x50] sm:$0x1] }
  0xa7   : > { %1523 = vmatpush.msk.msra.mxu0 %vm278_vm2, %v870_v22  ;;  %1528 = vmatpush.msk.msra.mxu1 %vm278_vm2, %v871_v23  ;;  %v873_v3 = vld [vmem:[#allocation2 + $0x58] sm:$0x1]  ;;  %v1880_v30 = vpop.permute.xlu2 %309  ;;  %v228_v32 = vsel %vm226_vm8, %v219_v20, %v1830_v29  ;;  %v229_v35 = vsel %vm226_vm8, %v217_v21, %v219_v20  ;;  %v230_v36 = vsel %vm226_vm8, %v1816_v18, %v217_v21 }
  0xa8   : > { %1533 = vmatpush.msk.msra.mxu2 %vm278_vm2, %v872_v24  ;;  %1538 = vmatpush.msk.msra.mxu3 %vm278_vm2, %v873_v3  ;;  %v261_v40 = vmul.f32 %v245_v28, %v228_v32  ;;  %v259_v41 = vmul.f32 %v243_v33, %v230_v36  ;;  %v260_v42 = vmul.f32 %v244_v34, %v229_v35 }
  0xaa   : > { %v276_v50 = vrot.slane %v261_v40, 2  ;;  %v274_v53 = vrot.slane %v259_v41, 4  ;;  %v275_v54 = vrot.slane %v260_v42, 3 }
  0xac   : > { %702 = vrot.lane.b32.xlu1 %v1746_v2, %s1705_s10  ;;  %700 = vrot.lane.b32.xlu0 %v1763_v6, %s1705_s10  ;;  %v285_v61 = vsel %vm284_vm4, %v274_v53, %v275_v54 }
  0xad   : > { %704 = vrot.lane.b32.xlu2 %v1761_v5, %s1705_s10  ;;  %v322_v5 = vld [vmem:[#allocation3 + $0x1] ss:$8 sm:$0xf0] }
  0xae   : > { %v296_v18 = vpop.permute.xlu1 %295  ;;  %v223_v47 = vpop.permute.xlu0 %222  ;;  %v323_v59 = vor.u32 %v322_v5, %v321_v51 }
  0xaf   : > { %v227_v52 = vsel %vm226_vm8, %v1830_v29, %v223_v47  ;;  %v234_v2 = vsel %vm226_vm8, %v223_v47, %v1811_v12  ;;  %v1906_v6 = vpop.permute.xlu2 %379  ;;  %v318_v15 = vsel %vm311_vm9, %v296_v18, %v1848_v49  ;;  %v319_v24 = vsel %vm311_vm9, %v1880_v30, %v296_v18 }
  0xb0   : > { %v255_v55 = vmul.f32 %v239_v43, %v234_v2  ;;  %v262_v56 = vmul.f32 %v246_v44, %v227_v52  ;;  %v327_v1 = vperm.slane %v323_v59, 2  ;;  %v328_v10 = vperm.slane %v323_v59, 3  ;;  %v402_v2 = vld [vmem:[#allocation3 + $0x2] ss:$8 sm:$0xf0] }
  0xb1   : > { %v326_v13 = vperm.slane %v323_v59, 1  ;;  %v325_v20 = vperm.slane %v323_v59, 0  ;;  %v330_v26 = vperm.slane %v323_v59, 5  ;;  %v331_v27 = vperm.slane %v323_v59, 6 }
  0xb2   : > { %v277_v57 = vrot.slane %v262_v56, 1  ;;  %v279_v58 = vsel %vm278_vm2, %v255_v55, %v271_v46 }
  0xb3   : > { %v283_v12 = vsel %vm282_vm3, %v279_v58, %v281_v60  ;;  %v342_v23 = vmul.f32 %v326_v13, %v318_v15  ;;  %v341_v28 = vmul.f32 %v325_v20, %v319_v24 }
  0xb4   : > { %v287_v29 = vsel %vm286_vm5, %v276_v50, %v277_v57  ;;  %708 = vrot.lane.b32.xlu1 %v1766_v7, %s1705_s10  ;;  %706 = vrot.lane.b32.xlu0 %v1751_v4, %s1705_s10  ;;  %v401_v50 = vld [vmem:[#allocation3 + $0x2] ss:$8 sm:$0xf] }
  0xb5   : > { %v289_v62 = vsel %vm288_vm6, %v285_v61, %v287_v29  ;;  %710 = vrot.lane.b32.xlu2 %v1773_v9, %s1705_s10  ;;  %v329_v9 = vperm.slane %v323_v59, 4  ;;  %v357_v34 = vrot.slane %v342_v23, 7  ;;  %v403_v53 = vor.u32 %v402_v2, %v401_v50 }
  0xb6   : > { %v291_v63 = vsel %vm290_vm7, %v283_v12, %v289_v62  ;;  %v302_v0 = vpop.permute.xlu1 %301  ;;  %v300_v11 = vpop.permute.xlu0 %299 }
  0xb7   : > { %293 = vst [vmem:[#allocation2] ss:$8 sm:$0xf] %v291_v63  ;;  %v316_v4 = vsel %vm311_vm9, %v300_v11, %v302_v0  ;;  %v317_v7 = vsel %vm311_vm9, %v1848_v49, %v300_v11  ;;  %v315_v16 = vsel %vm311_vm9, %v302_v0, %v1863_v14  ;;  %v1933_v17 = vpop.permute.xlu2 %385  ;;  %v332_v49 = vperm.slane %v323_v59, 7 }
  0xb8   : > { %294 = vst [vmem:[#allocation2] ss:$8 sm:$0xf0] %v291_v63  ;;  %v343_v21 = vmul.f32 %v327_v1, %v317_v7  ;;  %v344_v22 = vmul.f32 %v328_v10, %v316_v4  ;;  %v345_v25 = vmul.f32 %v329_v9, %v315_v16  ;;  %v407_v5 = vperm.slane %v403_v53, 2 }
  0xb9   : > { %v406_v55 = vperm.slane %v403_v53, 1  ;;  %v410_v56 = vperm.slane %v403_v53, 5  ;;  %v408_v29 = vperm.slane %v403_v53, 3  ;;  %v409_v12 = vperm.slane %v403_v53, 4 }
  0xba   : > { %v358_v3 = vrot.slane %v343_v21, 6  ;;  %v359_v31 = vrot.slane %v344_v22, 5  ;;  %v360_v37 = vrot.slane %v345_v25, 4  ;;  %v405_v4 = vperm.slane %v403_v53, 0 }
  0xbb   : > { %v411_v7 = vperm.slane %v403_v53, 6  ;;  %v412_v15 = vperm.slane %v403_v53, 7 }
  0xbc   : > { %712 = vrot.lane.b32.xlu0 %v1771_v8, %s1705_s10  ;;  %v365_v41 = vsel %vm280_vm1, %v358_v3, %v359_v31 }
  0xbe   : > { %v308_v32 = vpop.permute.xlu1 %307  ;;  %v306_v33 = vpop.permute.xlu0 %305 }
  0xbf   : > { %v312_v35 = vsel %vm311_vm9, %v308_v32, %v1880_v30  ;;  %v313_v36 = vsel %vm311_vm9, %v306_v33, %v308_v32  ;;  %v314_v8 = vsel %vm311_vm9, %v1863_v14, %v306_v33  ;;  %v1949_v45 = vpop.permute.xlu2 %455  ;;  %v364_v30 = vsel %vm278_vm2, %v341_v28, %v357_v34 }
  0xc0   : > { %v348_v38 = vmul.f32 %v332_v49, %v312_v35  ;;  %v346_v39 = vmul.f32 %v330_v26, %v314_v8  ;;  %v347_v40 = vmul.f32 %v331_v27, %v313_v36  ;;  %v366_v47 = vsel %vm282_vm3, %v364_v30, %v365_v41  ;;  %v482_v41 = vld [vmem:[#allocation3 + $0x3] ss:$8 sm:$0xf0] }
  0xc2   : > { %v363_v42 = vrot.slane %v348_v38, 1  ;;  %v361_v43 = vrot.slane %v346_v39, 3  ;;  %v362_v44 = vrot.slane %v347_v40, 2  ;;  %v481_v38 = vld [vmem:[#allocation3 + $0x3] ss:$8 sm:$0xf] }
  0xc4   : > { %v367_v46 = vsel %vm284_vm4, %v360_v37, %v361_v43  ;;  %v368_v18 = vsel %vm286_vm5, %v362_v44, %v363_v42  ;;  %v483_v43 = vor.u32 %v482_v41, %v481_v38 }
  0xc5   : > { %v369_v14 = vsel %vm288_vm6, %v367_v46, %v368_v18 }
  0xc6   : > { %v370_v48 = vsel %vm290_vm7, %v366_v47, %v369_v14  ;;  %v378_v51 = vpop.permute.xlu1 %377  ;;  %v376_v52 = vpop.permute.xlu0 %375  ;;  %v488_v44 = vperm.slane %v483_v43, 3  ;;  %v486_v30 = vperm.slane %v483_v43, 1  ;;  %v487_v14 = vperm.slane %v483_v43, 2 }
  0xc7   : > { %373 = vst [vmem:[#allocation2 + $0x1] ss:$8 sm:$0xf] %v370_v48  ;;  %v1958_v54 = vpop.permute.xlu2 %461  ;;  %v397_v59 = vsel %vm391_vm10, %v378_v51, %v1906_v6  ;;  %v398_v60 = vsel %vm391_vm10, %v376_v52, %v378_v51  ;;  %v491_v50 = vperm.slane %v483_v43, 6  ;;  %v489_v2 = vperm.slane %v483_v43, 4 }
  0xc8   : > { %374 = vst [vmem:[#allocation2 + $0x1] ss:$8 sm:$0xf0] %v370_v48  ;;  %v423_v0 = vmul.f32 %v407_v5, %v397_v59  ;;  %v422_v1 = vmul.f32 %v406_v55, %v398_v60  ;;  %v490_v53 = vperm.slane %v483_v43, 5 }
  0xca   : > { %v438_v9 = vrot.slane %v423_v0, 6  ;;  %v437_v16 = vrot.slane %v422_v1, 7 }
  0xce   : > { %v384_v57 = vpop.permute.xlu1 %383  ;;  %v382_v58 = vpop.permute.xlu0 %381 }
  0xcf   : > { %v394_v61 = vsel %vm391_vm10, %v384_v57, %v1933_v17  ;;  %v396_v62 = vsel %vm391_vm10, %v1906_v6, %v382_v58  ;;  %v395_v63 = vsel %vm391_vm10, %v382_v58, %v384_v57  ;;  %v468_v49 = vpop.permute.xlu2 %467 }
  0xd0   : > { %v426_v10 = vmul.f32 %v410_v56, %v394_v61  ;;  %v424_v11 = vmul.f32 %v408_v29, %v396_v62  ;;  %v425_v13 = vmul.f32 %v409_v12, %v395_v63  ;;  %v485_v12 = vperm.slane %v483_v43, 0  ;;  %v564_v63 = vld [vmem:[#allocation3 + $0x5] ss:$8 sm:$0xf] }
  0xd1   : > { %v492_v62 = vperm.slane %v483_v43, 7 }
  0xd2   : > { %v441_v20 = vrot.slane %v426_v10, 3  ;;  %v439_v23 = vrot.slane %v424_v11, 5  ;;  %v440_v26 = vrot.slane %v425_v13, 4  ;;  %v565_v10 = vld [vmem:[#allocation3 + $0x5] ss:$8 sm:$0xf0] }
  0xd4   : > { %v445_v34 = vsel %vm280_vm1, %v438_v9, %v439_v23  ;;  %v447_v35 = vsel %vm284_vm4, %v440_v26, %v441_v20 }
  0xd6   : > { %v390_v21 = vpop.permute.xlu1 %389  ;;  %v388_v22 = vpop.permute.xlu0 %387 }
  0xd7   : > { %v399_v6 = vsel %vm391_vm10, %v390_v21, %v376_v52  ;;  %v392_v24 = vsel %vm391_vm10, %v388_v22, %v390_v21  ;;  %v393_v25 = vsel %vm391_vm10, %v1933_v17, %v388_v22  ;;  %v1987_v42 = vpop.permute.xlu2 %540  ;;  %v566_v22 = vor.u32 %v565_v10, %v564_v63 }
  0xd8   : > { %v421_v27 = vmul.f32 %v405_v4, %v399_v6  ;;  %v427_v28 = vmul.f32 %v411_v7, %v393_v25  ;;  %v428_v3 = vmul.f32 %v412_v15, %v392_v24 }
  0xd9   : > { %v568_v41 = vperm.slane %v566_v22, 0 }
  0xda   : > { %v444_v31 = vsel %vm278_vm2, %v421_v27, %v437_v16  ;;  %v442_v32 = vrot.slane %v427_v28, 2  ;;  %v443_v33 = vrot.slane %v428_v3, 1  ;;  %v569_v28 = vperm.slane %v566_v22, 1 }
  0xdb   : > { %v446_v8 = vsel %vm282_vm3, %v444_v31, %v445_v34  ;;  %v571_v31 = vperm.slane %v566_v22, 3 }
  0xdc   : > { %v448_v36 = vsel %vm286_vm5, %v442_v32, %v443_v33  ;;  %v570_v33 = vperm.slane %v566_v22, 2 }
  0xdd   : > { %v449_v37 = vsel %vm288_vm6, %v447_v35, %v448_v36 }
  0xde   : > { %v450_v17 = vsel %vm290_vm7, %v446_v8, %v449_v37  ;;  %v460_v39 = vpop.permute.xlu1 %459  ;;  %v458_v40 = vpop.permute.xlu0 %457  ;;  %v575_v37 = vperm.slane %v566_v22, 7 }
  0xdf   : > { %453 = vst [vmem:[#allocation2 + $0x2] ss:$8 sm:$0xf] %v450_v17  ;;  %v476_v47 = vsel %vm471_vm11, %v460_v39, %v1958_v54  ;;  %v478_v48 = vsel %vm471_vm11, %v1949_v45, %v458_v40  ;;  %v477_v51 = vsel %vm471_vm11, %v458_v40, %v460_v39  ;;  %v547_v60 = vpop.permute.xlu2 %546 }
  0xe0   : > { %454 = vst [vmem:[#allocation2 + $0x2] ss:$8 sm:$0xf0] %v450_v17  ;;  %v504_v56 = vmul.f32 %v488_v44, %v476_v47  ;;  %v502_v57 = vmul.f32 %v486_v30, %v478_v48  ;;  %v503_v58 = vmul.f32 %v487_v14, %v477_v51  ;;  %v574_v44 = vperm.slane %v566_v22, 6 }
  0xe1   : > { %v572_v30 = vperm.slane %v566_v22, 4 }
  0xe2   : > { %v519_v0 = vrot.slane %v504_v56, 5  ;;  %v517_v1 = vrot.slane %v502_v57, 7  ;;  %v518_v4 = vrot.slane %v503_v58, 6 }
  0xe4   : > { %v525_v24 = vsel %vm280_vm1, %v518_v4, %v519_v0  ;;  %v644_v4 = vld [vmem:[#allocation3 + $0x6] ss:$8 sm:$0xf] }
  0xe6   : > { %v466_v46 = vpop.permute.xlu1 %465  ;;  %v464_v18 = vpop.permute.xlu0 %463 }
  0xe7   : > { %v473_v52 = vsel %vm471_vm11, %v466_v46, %v468_v49  ;;  %v474_v5 = vsel %vm471_vm11, %v464_v18, %v466_v46  ;;  %v475_v55 = vsel %vm471_vm11, %v1958_v54, %v464_v18  ;;  %v553_v27 = vpop.permute.xlu2 %552  ;;  %v573_v46 = vperm.slane %v566_v22, 5 }
  0xe8   : > { %v507_v59 = vmul.f32 %v491_v50, %v473_v52  ;;  %v505_v61 = vmul.f32 %v489_v2, %v475_v55  ;;  %v506_v29 = vmul.f32 %v490_v53, %v474_v5 }
  0xea   : > { %v522_v7 = vrot.slane %v507_v59, 2  ;;  %v520_v9 = vrot.slane %v505_v61, 4  ;;  %v521_v16 = vrot.slane %v506_v29, 3 }
  0xec   : > { %v527_v25 = vsel %vm284_vm4, %v520_v9, %v521_v16 }
  0xee   : > { %v539_v11 = vpop.permute.xlu1 %538  ;;  %v470_v13 = vpop.permute.xlu0 %469 }
  0xef   : > { %v472_v54 = vsel %vm471_vm11, %v468_v49, %v470_v13  ;;  %v479_v15 = vsel %vm471_vm11, %v470_v13, %v1949_v45  ;;  %v562_v39 = vsel %vm554_vm12, %v553_v27, %v539_v11  ;;  %v561_v43 = vsel %vm554_vm12, %v539_v11, %v1987_v42  ;;  %v623_v14 = vpop.permute.xlu2 %622 }
  0xf0   : > { %v501_v20 = vmul.f32 %v485_v12, %v479_v15  ;;  %v508_v21 = vmul.f32 %v492_v62, %v472_v54  ;;  %v591_v18 = vmul.f32 %v575_v37, %v562_v39  ;;  %v584_v2 = vmul.f32 %v568_v41, %v561_v43  ;;  %v645_v54 = vld [vmem:[#allocation3 + $0x6] ss:$8 sm:$0xf0] }
  0xf1   : > { %v646_v15 = vor.u32 %v645_v54, %v644_v4 }
  0xf2   : > { %v523_v23 = vrot.slane %v508_v21, 1  ;;  %v524_v6 = vsel %vm278_vm2, %v501_v20, %v517_v1  ;;  %v606_v58 = vrot.slane %v591_v18, 1 }
  0xf3   : > { %v526_v26 = vsel %vm282_vm3, %v524_v6, %v525_v24  ;;  %v650_v16 = vperm.slane %v646_v15, 2  ;;  %v651_v20 = vperm.slane %v646_v15, 3  ;;  %v649_v22 = vperm.slane %v646_v15, 1 }
  0xf4   : > { %v528_v49 = vsel %vm286_vm5, %v522_v7, %v523_v23 }
  0xf5   : > { %v529_v45 = vsel %vm288_vm6, %v527_v25, %v528_v49  ;;  %v652_v25 = vperm.slane %v646_v15, 4 }
  0xf6   : > { %v530_v3 = vsel %vm290_vm7, %v526_v26, %v529_v45  ;;  %v545_v32 = vpop.permute.xlu1 %544  ;;  %v543_v34 = vpop.permute.xlu0 %542 }
  0xf7   : > { %533 = vst [vmem:[#allocation2 + $0x3] ss:$8 sm:$0xf] %v530_v3  ;;  %v558_v35 = vsel %vm554_vm12, %v545_v32, %v547_v60  ;;  %v559_v36 = vsel %vm554_vm12, %v543_v34, %v545_v32  ;;  %v560_v8 = vsel %vm554_vm12, %v1987_v42, %v543_v34  ;;  %v629_v7 = vpop.permute.xlu2 %628  ;;  %v653_v32 = vperm.slane %v646_v15, 5 }
  0xf8   : > { %534 = vst [vmem:[#allocation2 + $0x3] ss:$8 sm:$0xf0] %v530_v3  ;;  %v585_v17 = vmul.f32 %v569_v28, %v560_v8  ;;  %v587_v38 = vmul.f32 %v571_v31, %v558_v35  ;;  %v586_v40 = vmul.f32 %v570_v33, %v559_v36  ;;  %v655_v31 = vperm.slane %v646_v15, 7 }
  0xf9   : > { %v654_v33 = vperm.slane %v646_v15, 6  ;;  %v648_v34 = vperm.slane %v646_v15, 0 }
  0xfa   : > { %v600_v47 = vrot.slane %v585_v17, 7  ;;  %v602_v48 = vrot.slane %v587_v38, 5  ;;  %v601_v50 = vrot.slane %v586_v40, 6 }
  0xfc   : > { %v607_v59 = vsel %vm278_vm2, %v584_v2, %v600_v47  ;;  %v608_v61 = vsel %vm280_vm1, %v601_v50, %v602_v48 }
  0xfd   : > { %v609_v1 = vsel %vm282_vm3, %v607_v59, %v608_v61  ;;  %v725_v59 = vld [vmem:[#allocation3 + $0x7] ss:$8 sm:$0xf0] }
  0xfe   : > { %v551_v51 = vpop.permute.xlu1 %550  ;;  %v549_v52 = vpop.permute.xlu0 %548 }
  0xff   : > { %v555_v53 = vsel %vm554_vm12, %v551_v51, %v553_v27  ;;  %v556_v5 = vsel %vm554_vm12, %v549_v52, %v551_v51  ;;  %v557_v42 = vsel %vm554_vm12, %v547_v60, %v549_v52  ;;  %v2052_v26 = vpop.permute.xlu2 %698 }
 0x100   : > { %v590_v55 = vmul.f32 %v574_v44, %v555_v53  ;;  %v588_v56 = vmul.f32 %v572_v30, %v557_v42  ;;  %v589_v57 = vmul.f32 %v573_v46, %v556_v5 }
 0x102   : > { %v605_v29 = vrot.slane %v590_v55, 2  ;;  %v603_v12 = vrot.slane %v588_v56, 4  ;;  %v604_v62 = vrot.slane %v589_v57, 3 }
 0x104   : > { %v611_v63 = vsel %vm286_vm5, %v605_v29, %v606_v58  ;;  %v610_v0 = vsel %vm284_vm4, %v603_v12, %v604_v62  ;;  %v724_v58 = vld [vmem:[#allocation3 + $0x7] ss:$8 sm:$0xf] }
 0x105   : > { %v612_v10 = vsel %vm288_vm6, %v610_v0, %v611_v63  ;;  %v726_v61 = vor.u32 %v725_v59, %v724_v58 }
 0x106   : > { %v613_v60 = vsel %vm290_vm7, %v609_v1, %v612_v10  ;;  %v621_v11 = vpop.permute.xlu1 %620  ;;  %v619_v13 = vpop.permute.xlu0 %618 }
 0x107   : > { %616 = vst [vmem:[#allocation2 + $0x5] ss:$8 sm:$0xf] %v613_v60  ;;  %v640_v24 = vsel %vm634_vm13, %v621_v11, %v623_v14  ;;  %v641_v35 = vsel %vm634_vm13, %v619_v13, %v621_v11  ;;  %v705_v51 = vpop.permute.xlu2 %704  ;;  %v730_v12 = vperm.slane %v726_v61, 2  ;;  %v731_v63 = vperm.slane %v726_v61, 3 }
 0x108   : > { %617 = vst [vmem:[#allocation2 + $0x5] ss:$8 sm:$0xf0] %v613_v60  ;;  %v665_v28 = vmul.f32 %v649_v22, %v640_v24  ;;  %v664_v18 = vmul.f32 %v648_v34, %v641_v35  ;;  %v729_v10 = vperm.slane %v726_v61, 1  ;;  %v732_v4 = vperm.slane %v726_v61, 4 }
 0x109   : > { %v734_v22 = vperm.slane %v726_v61, 6  ;;  %v728_v24 = vperm.slane %v726_v61, 0 }
 0x10a   : > { %v680_v38 = vrot.slane %v665_v28, 7 }
 0x10c   : > { %v687_v52 = vsel %vm278_vm2, %v664_v18, %v680_v38  ;;  %v874_v18 = vld [vmem:[#allocation2 + $0x60] sm:$0x1] }
 0x10e   : > { %v627_v9 = vpop.permute.xlu1 %626  ;;  %v625_v21 = vpop.permute.xlu0 %624 }
 0x10f   : > { %v638_v23 = vsel %vm634_vm13, %v625_v21, %v627_v9  ;;  %v639_v6 = vsel %vm634_vm13, %v623_v14, %v625_v21  ;;  %v637_v49 = vsel %vm634_vm13, %v627_v9, %v629_v7  ;;  %v711_v29 = vpop.permute.xlu2 %710 }
 0x110   : > { %v666_v45 = vmul.f32 %v650_v16, %v639_v6  ;;  %v667_v27 = vmul.f32 %v651_v20, %v638_v23  ;;  %v668_v3 = vmul.f32 %v652_v25, %v637_v49  ;;  %v735_v23 = vperm.slane %v726_v61, 7 }
 0x112   : > { %v681_v36 = vrot.slane %v666_v45, 6  ;;  %v682_v8 = vrot.slane %v667_v27, 5  ;;  %v683_v43 = vrot.slane %v668_v3, 4 }
 0x114   : > { %v688_v47 = vsel %vm280_vm1, %v681_v36, %v682_v8 }
 0x115   : > { %v689_v5 = vsel %vm282_vm3, %v687_v52, %v688_v47  ;;  %v875_v47 = vld [vmem:[#allocation2 + $0x68] sm:$0x1] }
 0x116   : > { %v633_v37 = vpop.permute.xlu1 %632  ;;  %v631_v17 = vpop.permute.xlu0 %630 }
 0x117   : > { %v642_v39 = vsel %vm634_vm13, %v633_v37, %v619_v13  ;;  %v635_v40 = vsel %vm634_vm13, %v631_v17, %v633_v37  ;;  %v636_v41 = vsel %vm634_vm13, %v629_v7, %v631_v17  ;;  %v733_v13 = vperm.slane %v726_v61, 5 }
 0x118   : > { %v671_v44 = vmul.f32 %v655_v31, %v642_v39  ;;  %v669_v30 = vmul.f32 %v653_v32, %v636_v41  ;;  %v670_v46 = vmul.f32 %v654_v33, %v635_v40  ;;  %v858_v41 = vld [vmem:[%s2211_s1] sm:$0xff] }
 0x11a   : > { %v686_v14 = vrot.slane %v671_v44, 1  ;;  %v684_v48 = vrot.slane %v669_v30, 3  ;;  %v685_v50 = vrot.slane %v670_v46, 2 }
 0x11c   : > { %v690_v2 = vsel %vm284_vm4, %v683_v43, %v684_v48  ;;  %v691_v53 = vsel %vm286_vm5, %v685_v50, %v686_v14  ;;  %v876_v14 = vld [vmem:[#allocation2 + $0x70] sm:$0x1]  ;;  %v877_v48 = vld [vmem:[#allocation2 + $0x78] sm:$0x1] }
 0x11d   : > { %v692_v42 = vsel %vm288_vm6, %v690_v2, %v691_v53  ;;  %v859_v53 = vld [vmem:[%s2211_s1 + $0x8] sm:$0xff] }
 0x11e   : > { %v693_v55 = vsel %vm290_vm7, %v689_v5, %v692_v42  ;;  %v703_v56 = vpop.permute.xlu1 %702  ;;  %v701_v57 = vpop.permute.xlu0 %700  ;;  %v860_v5 = vld [vmem:[%s2211_s1 + $0x10] sm:$0xff]  ;;  %v861_v42 = vld [vmem:[%s2211_s1 + $0x18] sm:$0xff] }
 0x11f   : > { %696 = vst [vmem:[#allocation2 + $0x6] ss:$8 sm:$0xf] %v693_v55  ;;  %v719_v1 = vsel %vm714_vm14, %v703_v56, %v705_v51  ;;  %v720_v11 = vsel %vm714_vm14, %v701_v57, %v703_v56  ;;  %v721_v45 = vsel %vm714_vm14, %v2052_v26, %v701_v57 }
 0x120   : > { %697 = vst [vmem:[#allocation2 + $0x6] ss:$8 sm:$0xf0] %v693_v55  ;;  %v746_v15 = vmul.f32 %v730_v12, %v719_v1  ;;  %v745_v16 = vmul.f32 %v729_v10, %v720_v11  ;;  %v744_v35 = vmul.f32 %v728_v24, %v721_v45 }
 0x122   : > { %v761_v6 = vrot.slane %v746_v15, 6  ;;  %v760_v27 = vrot.slane %v745_v16, 7 }
 0x124   : > { %v767_v17 = vsel %vm278_vm2, %v744_v35, %v760_v27 }
 0x126   : > { %v709_v62 = vpop.permute.xlu1 %708  ;;  %v707_v0 = vpop.permute.xlu0 %706 }
 0x127   : > { %v718_v60 = vsel %vm714_vm14, %v705_v51, %v707_v0  ;;  %v716_v7 = vsel %vm714_vm14, %v709_v62, %v711_v29  ;;  %v717_v54 = vsel %vm714_vm14, %v707_v0, %v709_v62 }
 0x128   : > { %v747_v9 = vmul.f32 %v731_v63, %v718_v60  ;;  %v749_v20 = vmul.f32 %v733_v13, %v716_v7  ;;  %v748_v21 = vmul.f32 %v732_v4, %v717_v54 }
 0x12a   : > { %v762_v25 = vrot.slane %v747_v9, 5  ;;  %v764_v31 = vrot.slane %v749_v20, 3  ;;  %v763_v32 = vrot.slane %v748_v21, 4 }
 0x12c   : > { %v768_v36 = vsel %vm280_vm1, %v761_v6, %v762_v25  ;;  %v770_v38 = vsel %vm284_vm4, %v763_v32, %v764_v31 }
 0x12d   : > { %v769_v40 = vsel %vm282_vm3, %v767_v17, %v768_v36 }
 0x12e   : > { %v713_v49 = vpop.permute.xlu0 %712 }
 0x12f   : > { %v715_v28 = vsel %vm714_vm14, %v711_v29, %v713_v49  ;;  %v722_v3 = vsel %vm714_vm14, %v713_v49, %v2052_v26 }
 0x130   : > { %v750_v33 = vmul.f32 %v734_v22, %v715_v28  ;;  %v751_v34 = vmul.f32 %v735_v23, %v722_v3 }
 0x132   : > { %v765_v8 = vrot.slane %v750_v33, 2  ;;  %v766_v37 = vrot.slane %v751_v34, 1 }
 0x134   : > { %v771_v39 = vsel %vm286_vm5, %v765_v8, %v766_v37 }
 0x135   : > { %v772_v19 = vsel %vm288_vm6, %v770_v38, %v771_v39 }
 0x136   : > { %v773_v26 = vsel %vm290_vm7, %v769_v40, %v772_v19 }
 0x137   : > { %776 = vst [vmem:[#allocation2 + $0x7] ss:$8 sm:$0xf] %v773_v26 }
 0x138   : > { %777 = vst [vmem:[#allocation2 + $0x7] ss:$8 sm:$0xf0] %v773_v26 }
 0x13e   : > { %v862_v43 = vld [vmem:[#allocation2] sm:$0xff]  ;;  %v863_v44 = vld [vmem:[#allocation2 + $0x8] sm:$0xff]  ;;  %v864_v30 = vld [vmem:[#allocation2 + $0x10] sm:$0xff] }
 0x13f   : > { %930 = vmatpush.msra.mxu0 %v862_v43  ;;  %959 = vmatpush.msra.mxu1 %v863_v44  ;;  %v865_v46 = vld [vmem:[#allocation2 + $0x18] sm:$0xff]  ;;  %v866_v50 = vld [vmem:[#allocation2 + $0x20] sm:$0xff]  ;;  %v867_v51 = vld [vmem:[#allocation2 + $0x28] sm:$0xff] }
 0x140   : > { %988 = vmatpush.msra.mxu2 %v864_v30  ;;  %1017 = vmatpush.msra.mxu3 %v865_v46  ;;  %v868_v52 = vld [vmem:[#allocation2 + $0x30] sm:$0xff]  ;;  %v869_v2 = vld [vmem:[#allocation2 + $0x38] sm:$0xff] }
 0x141   : > { %1539 = vmatmul.msk.f32.vlgmr.msra.gmra.mxu3 %vm878_vm15, %v858_v41  ;;  %1543 = vmatpush.msk.msrb.mxu0 %vm278_vm2, %v874_v18 }
 0x142   : > { %1548 = vmatpush.msk.msrb.mxu1 %vm278_vm2, %v875_v47  ;;  %1553 = vmatpush.msk.msrb.mxu2 %vm278_vm2, %v876_v14 }
 0x143   : > { %1558 = vmatpush.msk.msrb.mxu3 %vm278_vm2, %v877_v48  ;;  %1534 = vmatmul.msk.f32.vlgmr.msra.gmra.mxu2 %vm878_vm15, %v858_v41 }
 0x144   : > { %1046 = vmatpush.msrb.mxu0 %v866_v50  ;;  %1075 = vmatpush.msrb.mxu1 %v867_v51 }
 0x145   : > { %1104 = vmatpush.msrb.mxu2 %v868_v52  ;;  %1133 = vmatpush.msrb.mxu3 %v869_v2 }
 0x146   : > { %1529 = vmatmul.msk.f32.vlgmr.msra.gmra.mxu1 %vm878_vm15, %v858_v41  ;;  %1524 = vmatmul.msk.f32.vlgmr.msra.gmra.mxu0 %vm878_vm15, %v858_v41 }
 0x149   : > { %1540 = vmatmul.msk.f32.gmra.mxu3 %vm878_vm15, %v859_v53 }
 0x14b   : > { %1535 = vmatmul.msk.f32.gmra.mxu2 %vm878_vm15, %v859_v53 }
 0x14e   : > { %1530 = vmatmul.msk.f32.gmra.mxu1 %vm878_vm15, %v859_v53  ;;  %1525 = vmatmul.msk.f32.gmra.mxu0 %vm878_vm15, %v859_v53 }
 0x151   : > { %1541 = vmatmul.msk.f32.gmra.mxu3 %vm878_vm15, %v860_v5 }
 0x153   : > { %1536 = vmatmul.msk.f32.gmra.mxu2 %vm878_vm15, %v860_v5 }
 0x156   : > { %1531 = vmatmul.msk.f32.gmra.mxu1 %vm878_vm15, %v860_v5  ;;  %1526 = vmatmul.msk.f32.gmra.mxu0 %vm878_vm15, %v860_v5 }
 0x159   : > { %1542 = vmatmul.msk.f32.gmra.mxu3 %vm878_vm15, %v861_v42 }
 0x15b   : > { %1537 = vmatmul.msk.f32.gmra.mxu2 %vm878_vm15, %v861_v42 }
 0x15e   : > { %1532 = vmatmul.msk.f32.gmra.mxu1 %vm878_vm15, %v861_v42  ;;  %1527 = vmatmul.msk.f32.gmra.mxu0 %vm878_vm15, %v861_v42 }
 0x161   : > { %1559 = vmatmul.msk.f32.vlgmr.msrb.gmra.mxu3 %vm878_vm15, %v858_v41 }
 0x163   : > { %1554 = vmatmul.msk.f32.vlgmr.msrb.gmra.mxu2 %vm878_vm15, %v858_v41 }
 0x166   : > { %1549 = vmatmul.msk.f32.vlgmr.msrb.gmra.mxu1 %vm878_vm15, %v858_v41  ;;  %1544 = vmatmul.msk.f32.vlgmr.msrb.gmra.mxu0 %vm878_vm15, %v858_v41 }
 0x169   : > { %1560 = vmatmul.msk.f32.gmra.mxu3 %vm878_vm15, %v859_v53 }
 0x16b   : > { %1555 = vmatmul.msk.f32.gmra.mxu2 %vm878_vm15, %v859_v53 }
 0x16e   : > { %1550 = vmatmul.msk.f32.gmra.mxu1 %vm878_vm15, %v859_v53  ;;  %1545 = vmatmul.msk.f32.gmra.mxu0 %vm878_vm15, %v859_v53 }
 0x171   : > { %1561 = vmatmul.msk.f32.gmra.mxu3 %vm878_vm15, %v860_v5 }
 0x173   : > { %1556 = vmatmul.msk.f32.gmra.mxu2 %vm878_vm15, %v860_v5 }
 0x176   : > { %1551 = vmatmul.msk.f32.gmra.mxu1 %vm878_vm15, %v860_v5  ;;  %1546 = vmatmul.msk.f32.gmra.mxu0 %vm878_vm15, %v860_v5 }
 0x179   : > { %1562 = vmatmul.msk.f32.gmra.mxu3 %vm878_vm15, %v861_v42 }
 0x17b   : > { %1557 = vmatmul.msk.f32.gmra.mxu2 %vm878_vm15, %v861_v42 }
 0x17e   : > { %1552 = vmatmul.msk.f32.gmra.mxu1 %vm878_vm15, %v861_v42  ;;  %1547 = vmatmul.msk.f32.gmra.mxu0 %vm878_vm15, %v861_v42 }
 0x1c3   : > { %v961_v55 = vpop.f32.mrf.mxu1  ;;  %v932_v56 = vpop.f32.mrf.mxu0 }
 0x1c4   : > { %v1155_v57 = vrot.slane %v961_v55, 4  ;;  %v1019_v58 = vpop.f32.mrf.mxu3 }
 0x1c5   : > { %v1227_v59 = vrot.slane %v1019_v58, 4 }
 0x1c6   : > { %v1159_v61 = vsel %vm290_vm7, %v932_v56, %v1155_v57  ;;  %v1160_v29 = vsel %vm290_vm7, %v1155_v57, %v932_v56  ;;  %v990_v12 = vpop.f32.mrf.mxu2 }
 0x1c7   : > { %v1161_v62 = vrot.slane %v1160_v29, 4  ;;  %1563 = vst.sshfl [vmem:[%s1743_s29] sm:$0xff pattern:$0x75316420] %v1159_v61  ;;  %v1231_v63 = vsel %vm290_vm7, %v990_v12, %v1227_v59  ;;  %v1232_v0 = vsel %vm290_vm7, %v1227_v59, %v990_v12 }
 0x1c8   : > { %v1233_v1 = vrot.slane %v1232_v0, 4  ;;  %1597 = vst.sshfl [vmem:[%s1743_s29 + $0x50] sm:$0xff pattern:$0x75316420] %v1231_v63 }
 0x1c9   : > { %1564 = vst.sshfl [vmem:[%s1743_s29 + $0x8] sm:$0xff pattern:$0x75316420] %v1161_v62 }
 0x1ca   : > { %1598 = vst.sshfl [vmem:[%s1743_s29 + $0x58] sm:$0xff pattern:$0x75316420] %v1233_v1 }
 0x1cb   : > { %v964_v10 = vpop.f32.mrf.mxu1  ;;  %v935_v60 = vpop.f32.mrf.mxu0 }
 0x1cc   : > { %v1156_v11 = vrot.slane %v964_v10, 4  ;;  %v1022_v13 = vpop.f32.mrf.mxu3 }
 0x1cd   : > { %v1228_v4 = vrot.slane %v1022_v13, 4 }
 0x1ce   : > { %v1162_v7 = vsel %vm290_vm7, %v935_v60, %v1156_v11  ;;  %v1163_v54 = vsel %vm290_vm7, %v1156_v11, %v935_v60  ;;  %v993_v15 = vpop.f32.mrf.mxu2 }
 0x1cf   : > { %v1164_v9 = vrot.slane %v1163_v54, 4  ;;  %1565 = vst.sshfl [vmem:[%s1743_s29 + $0x10] sm:$0xff pattern:$0x75316420] %v1162_v7  ;;  %v1234_v16 = vsel %vm290_vm7, %v993_v15, %v1228_v4  ;;  %v1235_v20 = vsel %vm290_vm7, %v1228_v4, %v993_v15 }
 0x1d0   : > { %v1236_v21 = vrot.slane %v1235_v20, 4  ;;  %1599 = vst.sshfl [vmem:[%s1743_s29 + $0x60] sm:$0xff pattern:$0x75316420] %v1234_v16 }
 0x1d1   : > { %1566 = vst.sshfl [vmem:[%s1743_s29 + $0x18] sm:$0xff pattern:$0x75316420] %v1164_v9 }
 0x1d2   : > { %1600 = vst.sshfl [vmem:[%s1743_s29 + $0x68] sm:$0xff pattern:$0x75316420] %v1236_v21 }
 0x1d3   : > { %v967_v22 = vpop.f32.mrf.mxu1  ;;  %v938_v23 = vpop.f32.mrf.mxu0 }
 0x1d4   : > { %v1157_v6 = vrot.slane %v967_v22, 4  ;;  %v1025_v24 = vpop.f32.mrf.mxu3 }
 0x1d5   : > { %v1229_v25 = vrot.slane %v1025_v24, 4 }
 0x1d6   : > { %v1165_v49 = vsel %vm290_vm7, %v938_v23, %v1157_v6  ;;  %v1166_v45 = vsel %vm290_vm7, %v1157_v6, %v938_v23  ;;  %v996_v27 = vpop.f32.mrf.mxu2 }
 0x1d7   : > { %v1167_v28 = vrot.slane %v1166_v45, 4  ;;  %1567 = vst.sshfl [vmem:[%s1743_s29 + $0x20] sm:$0xff pattern:$0x75316420] %v1165_v49  ;;  %v1237_v3 = vsel %vm290_vm7, %v996_v27, %v1229_v25  ;;  %v1238_v31 = vsel %vm290_vm7, %v1229_v25, %v996_v27 }
 0x1d8   : > { %v1239_v32 = vrot.slane %v1238_v31, 4  ;;  %1601 = vst.sshfl [vmem:[%s1743_s29 + $0x70] sm:$0xff pattern:$0x75316420] %v1237_v3 }
 0x1d9   : > { %1568 = vst.sshfl [vmem:[%s1743_s29 + $0x28] sm:$0xff pattern:$0x75316420] %v1167_v28 }
 0x1da   : > { %1602 = vst.sshfl [vmem:[%s1743_s29 + $0x78] sm:$0xff pattern:$0x75316420] %v1239_v32 }
 0x1db   : > { %v970_v33 = vpop.f32.mrf.mxu1  ;;  %v941_v34 = vpop.f32.mrf.mxu0 }
 0x1dc   : > { %v1158_v35 = vrot.slane %v970_v33, 4  ;;  %v1028_v36 = vpop.f32.mrf.mxu3 }
 0x1dd   : > { %v1230_v8 = vrot.slane %v1028_v36, 4 }
 0x1de   : > { %v1168_v37 = vsel %vm290_vm7, %v941_v34, %v1158_v35  ;;  %v1169_v17 = vsel %vm290_vm7, %v1158_v35, %v941_v34  ;;  %v999_v38 = vpop.f32.mrf.mxu2 }
 0x1df   : > { %v1170_v39 = vrot.slane %v1169_v17, 4  ;;  %1569 = vst.sshfl [vmem:[%s1743_s29 + $0x30] sm:$0xff pattern:$0x75316420] %v1168_v37  ;;  %v1240_v40 = vsel %vm290_vm7, %v999_v38, %v1230_v8  ;;  %v1241_v19 = vsel %vm290_vm7, %v1230_v8, %v999_v38 }
 0x1e0   : > { %v1242_v26 = vrot.slane %v1241_v19, 4  ;;  %1603 = vst.sshfl [vmem:[%s1743_s29 + $0x80] sm:$0xff pattern:$0x75316420] %v1240_v40 }
 0x1e1   : > { %1570 = vst.sshfl [vmem:[%s1743_s29 + $0x38] sm:$0xff pattern:$0x75316420] %v1170_v39 }
 0x1e2   : > { %1604 = vst.sshfl [vmem:[%s1743_s29 + $0x88] sm:$0xff pattern:$0x75316420] %v1242_v26 }
 0x1e3   : > { %v1077_v41 = vpop.f32.mrf.mxu1  ;;  %v1048_v43 = vpop.f32.mrf.mxu0 }
 0x1e4   : > { %v1300_v44 = vrot.slane %v1077_v41, 4  ;;  %v1135_v30 = vpop.f32.mrf.mxu3 }
 0x1e5   : > { %v1373_v46 = vrot.slane %v1135_v30, 4 }
 0x1e6   : > { %v1304_v18 = vsel %vm290_vm7, %v1048_v43, %v1300_v44  ;;  %v1305_v47 = vsel %vm290_vm7, %v1300_v44, %v1048_v43  ;;  %v1106_v14 = vpop.f32.mrf.mxu2 }
 0x1e7   : > { %v1306_v48 = vrot.slane %v1305_v47, 4  ;;  %1605 = vst.sshfl [vmem:[%s1743_s29 + $0xa0] sm:$0xff pattern:$0x75316420] %v1304_v18  ;;  %v1377_v50 = vsel %vm290_vm7, %v1106_v14, %v1373_v46  ;;  %v1378_v51 = vsel %vm290_vm7, %v1373_v46, %v1106_v14 }
 0x1e8   : > { %v1379_v52 = vrot.slane %v1378_v51, 4  ;;  %1613 = vst.sshfl [vmem:[%s1743_s29 + $0xf0] sm:$0xff pattern:$0x75316420] %v1377_v50 }
 0x1e9   : > { %1606 = vst.sshfl [vmem:[%s1743_s29 + $0xa8] sm:$0xff pattern:$0x75316420] %v1306_v48 }
 0x1ea   : > { %1614 = vst.sshfl [vmem:[%s1743_s29 + $0xf8] sm:$0xff pattern:$0x75316420] %v1379_v52 }
 0x1eb   : > { %v1080_v2 = vpop.f32.mrf.mxu1  ;;  %v1051_v53 = vpop.f32.mrf.mxu0 }
 0x1ec   : > { %v1301_v5 = vrot.slane %v1080_v2, 4  ;;  %v1138_v42 = vpop.f32.mrf.mxu3 }
 0x1ed   : > { %v1374_v55 = vrot.slane %v1138_v42, 4 }
 0x1ee   : > { %v1307_v56 = vsel %vm290_vm7, %v1051_v53, %v1301_v5  ;;  %v1308_v57 = vsel %vm290_vm7, %v1301_v5, %v1051_v53  ;;  %v1109_v58 = vpop.f32.mrf.mxu2 }
 0x1ef   : > { %v1309_v59 = vrot.slane %v1308_v57, 4  ;;  %1607 = vst.sshfl [vmem:[%s1743_s29 + $0xb0] sm:$0xff pattern:$0x75316420] %v1307_v56  ;;  %v1380_v61 = vsel %vm290_vm7, %v1109_v58, %v1374_v55  ;;  %v1381_v29 = vsel %vm290_vm7, %v1374_v55, %v1109_v58 }
 0x1f0   : > { %v1382_v12 = vrot.slane %v1381_v29, 4  ;;  %1615 = vst.sshfl [vmem:[%s1743_s29 + $0x100] sm:$0xff pattern:$0x75316420] %v1380_v61 }
 0x1f1   : > { %1608 = vst.sshfl [vmem:[%s1743_s29 + $0xb8] sm:$0xff pattern:$0x75316420] %v1309_v59 }
 0x1f2   : > { %1616 = vst.sshfl [vmem:[%s1743_s29 + $0x108] sm:$0xff pattern:$0x75316420] %v1382_v12 }
 0x1f3   : > { %v1083_v62 = vpop.f32.mrf.mxu1  ;;  %v1054_v63 = vpop.f32.mrf.mxu0 }
 0x1f4   : > { %v1302_v0 = vrot.slane %v1083_v62, 4  ;;  %v1141_v1 = vpop.f32.mrf.mxu3 }
 0x1f5   : > { %v1375_v10 = vrot.slane %v1141_v1, 4 }
 0x1f6   : > { %v1310_v60 = vsel %vm290_vm7, %v1054_v63, %v1302_v0  ;;  %v1311_v11 = vsel %vm290_vm7, %v1302_v0, %v1054_v63  ;;  %v1112_v13 = vpop.f32.mrf.mxu2 }
 0x1f7   : > { %v1312_v4 = vrot.slane %v1311_v11, 4  ;;  %1609 = vst.sshfl [vmem:[%s1743_s29 + $0xc0] sm:$0xff pattern:$0x75316420] %v1310_v60  ;;  %v1383_v7 = vsel %vm290_vm7, %v1112_v13, %v1375_v10  ;;  %v1384_v54 = vsel %vm290_vm7, %v1375_v10, %v1112_v13 }
 0x1f8   : > { %v1385_v15 = vrot.slane %v1384_v54, 4  ;;  %1617 = vst.sshfl [vmem:[%s1743_s29 + $0x110] sm:$0xff pattern:$0x75316420] %v1383_v7 }
 0x1f9   : > { %1610 = vst.sshfl [vmem:[%s1743_s29 + $0xc8] sm:$0xff pattern:$0x75316420] %v1312_v4 }
 0x1fa   : > { %1618 = vst.sshfl [vmem:[%s1743_s29 + $0x118] sm:$0xff pattern:$0x75316420] %v1385_v15 }
 0x1fb   : > { %v1086_v9 = vpop.f32.mrf.mxu1  ;;  %v1057_v16 = vpop.f32.mrf.mxu0 }
 0x1fc   : > { %v1303_v20 = vrot.slane %v1086_v9, 4  ;;  %v1144_v21 = vpop.f32.mrf.mxu3 }
 0x1fd   : > { %v1376_v22 = vrot.slane %v1144_v21, 4 }
 0x1fe   : > { %v1313_v23 = vsel %vm290_vm7, %v1057_v16, %v1303_v20  ;;  %v1314_v6 = vsel %vm290_vm7, %v1303_v20, %v1057_v16  ;;  %v1115_v24 = vpop.f32.mrf.mxu2 }
 0x1ff   : > { %v1315_v25 = vrot.slane %v1314_v6, 4  ;;  %1611 = vst.sshfl [vmem:[%s1743_s29 + $0xd0] sm:$0xff pattern:$0x75316420] %v1313_v23  ;;  %v1386_v49 = vsel %vm290_vm7, %v1115_v24, %v1376_v22  ;;  %v1387_v45 = vsel %vm290_vm7, %v1376_v22, %v1115_v24 }
 0x200   : > { %v1388_v27 = vrot.slane %v1387_v45, 4  ;;  %1619 = vst.sshfl [vmem:[%s1743_s29 + $0x120] sm:$0xff pattern:$0x75316420] %v1386_v49 }
 0x201   : > { %1612 = vst.sshfl [vmem:[%s1743_s29 + $0xd8] sm:$0xff pattern:$0x75316420] %v1315_v25 }
 0x202   : > { %1620 = vst.sshfl [vmem:[%s1743_s29 + $0x128] sm:$0xff pattern:$0x75316420] %v1388_v27 }
 0x203 PF: > { %s14_s12 = sadd.s32 1, %s1692_s12  }
 0x204   : > { %p11_p8 = scmp.ge.s32.totalorder %s14_s12, 4  }
 0x206   :  { %13 = sbr.rel (!%p11_p8) target bundleno = 1 (0x1), region = 85 }
 0x20b   :  { %1470 = vsyncpa [#allocation4], 1 }
 0x20c   :  { %1472 = vsyncpa [#allocation4 + $0x1], 1 }

</bundles_post_ra>
